<compile_context>
chip_gen: v7x
topology: tpu7x:2x2x1
jax: 0.10.0
libtpu: 0.0.40
codegen_flags: <defaults>
</compile_context>

<pallas_src>
import jax
import jax.numpy as jnp
from jax.experimental import pallas as pl
from jax.experimental.pallas import tpu as pltpu


# Model configuration (small, deterministic).
CIN = 4        # in_channels
C1X1 = 4       # num_channels_filter_1x1
C3IN = 4       # num_channels_filter_3x3_in
C3OUT = 8      # num_channels_filter_3x3_out

CAUG = CIN + 1          # real channels + constant-1 indicator channel (carries conv biases)
KDIM = 25 * CAUG        # 125 patch features per output position (5x5 window x CAUG)
KPAD = 128              # contraction dim padded to a full lane tile
NCV = 2 * C3OUT         # conv output channels in concat order (x2 | x3)
CTOT = CIN + NCV        # total output channels (x1 | x2 | x3) = 20
TM = 128                # lane tile over the flattened (n, oh, ow) output-position axis


# ----------------------------------------------------------------------------
# Pallas kernel: whole ReductionBlock5x5 in one launch.
# ----------------------------------------------------------------------------
def _reduction5x5_kernel(pt_ref, w_ref, out_ref):
    # pt_ref : [KPAD, TM]   im2col'd 5x5/s2/p1 patches; row k = (ki, kj, ch), m on lanes.
    # w_ref  : [NCV, KPAD]  fused conv weight (branch biases folded into indicator row).
    # out_ref: [CTOT, TM]   rows 0..CIN-1 = max-pool, rows CIN..CTOT-1 = conv channels.

    # ---- Block1 (MaxPool 3x3 / s2, VALID): the 9 pool taps are exactly the (1..3, 1..3)
    #      taps of the 5x5 footprint; take the CIN real channels of each tap group and
    #      reduce with 8 dense VPU max ops (each operand is [CIN, TM], M on lanes).
    pool = None
    for ki in range(1, 4):
        for kj in range(1, 4):
            base = (ki * 5 + kj) * CAUG
            win = pt_ref[base:base + CIN, :]
            pool = win if pool is None else jnp.maximum(pool, win)
    out_ref[0:CIN, :] = pool

    # ---- Block2 + (exactly collapsed) Block3: one MXU matmul, columns already in
    #      torch-concat order; biases ride in via the indicator row of tap (2,2).
    conv = jnp.dot(w_ref[...], pt_ref[...], preferred_element_type=jnp.float32)
    out_ref[CIN:CTOT, :] = conv.astype(out_ref.dtype)


# ----------------------------------------------------------------------------
# Parameters + exact algebraic collapse of the branches into one fused weight.
# ----------------------------------------------------------------------------
def init_params(key):
    ks = jax.random.split(key, 8)
    p = {}
    # Block2: Conv2d(Cin -> C3out, 3x3, stride=2, pad=0)   (HWIO layout)
    p["w2"] = 0.1 * jax.random.normal(ks[0], (3, 3, CIN, C3OUT), jnp.float32)
    p["b2"] = 0.01 * jax.random.normal(ks[1], (C3OUT,), jnp.float32)
    # Block3: Conv2d(Cin->C1,1x1), Conv2d(C1->C3in,3x3,p=1), Conv2d(C3in->C3out,3x3,s=2)
    p["wa"] = 0.1 * jax.random.normal(ks[2], (CIN, C1X1), jnp.float32)
    p["ba"] = 0.01 * jax.random.normal(ks[3], (C1X1,), jnp.float32)
    p["wb"] = 0.1 * jax.random.normal(ks[4], (3, 3, C1X1, C3IN), jnp.float32)
    p["bb"] = 0.01 * jax.random.normal(ks[5], (C3IN,), jnp.float32)
    p["wc"] = 0.1 * jax.random.normal(ks[6], (3, 3, C3IN, C3OUT), jnp.float32)
    p["bc"] = 0.01 * jax.random.normal(ks[7], (C3OUT,), jnp.float32)
    return p


def build_fused_weight(p):
    """Collapse Block2 and Block3 into one [NCV, KPAD] weight, biases folded in.

    Patch rows are ordered (ki, kj, ch) over a 5x5 window of the padded, augmented input
    (ch = CIN real channels + 1 constant-1 indicator channel)."""
    # W5[k1,k2,c1,co] = sum_{p+u=k1, q+v=k2} wb[p,q] @ wc[u,v]   (Block3 convB o convC)
    w5 = jnp.zeros((5, 5, C1X1, C3OUT), jnp.float32)
    for pi in range(3):
        for qi in range(3):
            for ui in range(3):
                for vi in range(3):
                    w5 = w5.at[pi + ui, qi + vi].add(p["wb"][pi, qi] @ p["wc"][ui, vi])
    # Fold the 1x1 conv weight in (per-pixel, commutes with the window gather).
    w3_eff = jnp.einsum("ic,hwco->hwio", p["wa"], w5)                 # [5,5,CIN,C3OUT]
    # The 1x1 bias only exists where the intermediate activation is NOT zero-padding:
    # carried exactly by the indicator channel (1 inside the image, 0 in the padding).
    w3_ind = jnp.einsum("c,hwco->hwo", p["ba"], w5)                   # [5,5,C3OUT]
    w3_aug = jnp.concatenate([w3_eff, w3_ind[:, :, None, :]], axis=2)  # [5,5,CAUG,C3OUT]
    b3 = p["bc"] + jnp.einsum("c,hwco->o", p["bb"], p["wc"])          # bb, bc collapsed

    # Block2 embedded at offset (1,1) of the 5x5 footprint (its taps never hit padding).
    w2_aug = jnp.zeros((5, 5, CAUG, C3OUT), jnp.float32)
    w2_aug = w2_aug.at[1:4, 1:4, :CIN, :].set(p["w2"])

    w = jnp.concatenate([w2_aug.reshape(KDIM, C3OUT),                 # cols 0..7  -> x2
                         w3_aug.reshape(KDIM, C3OUT)], axis=1)        # cols 8..15 -> x3
    # Fold both branch biases into the indicator row of the window-centre tap (2,2):
    # that indicator value is 1 for every valid output position, so W@patches adds b.
    k_bias = (2 * 5 + 2) * CAUG + CIN
    w = w.at[k_bias].add(jnp.concatenate([p["b2"], b3]))
    w = jnp.pad(w, ((0, KPAD - KDIM), (0, 0)))                        # pad K: 125 -> 128
    return jnp.transpose(w)                                            # [NCV, KPAD]


# ----------------------------------------------------------------------------
# Forward: thin input-side im2col (XLA glue) + ONE pallas_call + NCHW unflatten.
# ----------------------------------------------------------------------------
def forward(x_nchw, w_fused):
    n, cin, h, w = x_nchw.shape
    oh = (h - 3) // 2 + 1
    ow = (w - 3) // 2 + 1
    m = n * oh * ow
    m_pad = pl.cdiv(m, TM) * TM

    # Augment (+indicator channel) and spatially pad for the fused 5x5/s2/p1 conv.
    x = jnp.transpose(x_nchw, (0, 2, 3, 1))                            # NCHW -> NHWC
    xa = jnp.concatenate([x, jnp.ones((n, h, w, 1), x.dtype)], axis=-1)  # [N,H,W,CAUG]
    xp = jnp.pad(xa, ((0, 0), (1, 1), (1, 1), (0, 0)))                 # [N,H+2,W+2,CAUG]

    # im2col, directly in the kernel's lane-dense layout: patchesT[k=(ki,kj,ch), m=(n,oh,ow)]
    taps = []
    for ki in range(5):
        for kj in range(5):
            taps.append(xp[:, ki:ki + 2 * oh - 1:2, kj:kj + 2 * ow - 1:2, :])
    pt = jnp.stack(taps, 0).transpose(0, 4, 1, 2, 3).reshape(KDIM, m)  # [125, M]
    pt = jnp.pad(pt, ((0, KPAD - KDIM), (0, m_pad - m)))               # [128, m_pad]

    out = pl.pallas_call(
        _reduction5x5_kernel,
        out_shape=jax.ShapeDtypeStruct((CTOT, m_pad), jnp.float32),
        grid=(m_pad // TM,),
        in_specs=[
            pl.BlockSpec((KPAD, TM), lambda i: (0, i)),
            pl.BlockSpec((NCV, KPAD), lambda i: (0, 0)),
        ],
        out_specs=pl.BlockSpec((CTOT, TM), lambda i: (0, i)),
        compiler_params=pltpu.CompilerParams(dimension_semantics=("parallel",)),
    )(pt, w_fused)

    # Un-flatten the single lane-dense slab back to NCHW; rows are already in
    # torch.concat([x1, x2, x3], dim=1) order.
    return jnp.transpose(out[:, :m].reshape(CTOT, n, oh, ow), (1, 0, 2, 3))


# ----------------------------------------------------------------------------
# Pure-JAX reference (mirrors the PyTorch module op-by-op) for a correctness check.
# ----------------------------------------------------------------------------
def reference_forward(x_nchw, p):
    dn = ("NCHW", "HWIO", "NCHW")

    def conv(x, wgt, b, stride, pad):
        y = jax.lax.conv_general_dilated(x, wgt, window_strides=(stride, stride),
                                         padding=pad, dimension_numbers=dn)
        return y + b.reshape(1, -1, 1, 1)

    x1 = jax.lax.reduce_window(x_nchw, -jnp.inf, jax.lax.max,
                               window_dimensions=(1, 1, 3, 3),
                               window_strides=(1, 1, 2, 2), padding="VALID")
    x2 = conv(x_nchw, p["w2"], p["b2"], 2, "VALID")
    y = conv(x_nchw, p["wa"].reshape(1, 1, CIN, C1X1), p["ba"], 1, "VALID")
    y = conv(y, p["wb"], p["bb"], 1, ((1, 1), (1, 1)))
    x3 = conv(y, p["wc"], p["bc"], 2, "VALID")
    return jnp.concatenate([x1, x2, x3], axis=1)


if __name__ == "__main__":
    key = jax.random.PRNGKey(0)
    k_img, k_par = jax.random.split(key)
    img = jax.random.normal(k_img, (2, CIN, 16, 16), jnp.float32)   # NCHW like PyTorch
    params = init_params(k_par)
    w_fused = build_fused_weight(params)                            # one-time fusion

    out = jax.jit(forward)(img, w_fused)
    out = jax.block_until_ready(out)
    assert out.shape == (2, CIN + 2 * C3OUT, 7, 7), out.shape
    assert bool(jnp.all(jnp.isfinite(out)))

    ref = reference_forward(img, params)
    assert jnp.allclose(out, ref, atol=2e-3, rtol=2e-2), float(jnp.max(jnp.abs(out - ref)))

    print("KERNEL_OK")
</pallas_src>

<mosaic_0001>
module attributes {stable_mosaic.version = 11 : i64} {
  func.func @_reduction5x5_kernel(%arg0: i32, %arg1: memref<128x128xf32, #tpu.memory_space<vmem>>, %arg2: memref<16x128xf32, #tpu.memory_space<vmem>>, %arg3: memref<20x128xf32, #tpu.memory_space<vmem>>) attributes {dimension_semantics = [#tpu.dimension_semantics<parallel>], iteration_bounds = array<i64: 1>, scalar_prefetch = 0 : i64, scratch_operands = 0 : i64, tpu.core_type = #tpu.core_type<tc>, window_params = [{transform_indices = @transform_0, window_bounds = array<i64: 128, 128>}, {pipeline_mode = #tpu.pipeline_mode<synchronous>, transform_indices = @transform_1, window_bounds = array<i64: 16, 128>}, {transform_indices = @transform_2, window_bounds = array<i64: 20, 128>}]} {
    %c30 = arith.constant 30 : index
    %c0 = arith.constant 0 : index
    %0 = vector.load %arg1[%c30, %c0] : memref<128x128xf32, #tpu.memory_space<vmem>>, vector<4x128xf32>
    %c35 = arith.constant 35 : index
    %c0_0 = arith.constant 0 : index
    %1 = vector.load %arg1[%c35, %c0_0] : memref<128x128xf32, #tpu.memory_space<vmem>>, vector<4x128xf32>
    %2 = arith.maximumf %0, %1 : vector<4x128xf32>
    %c40 = arith.constant 40 : index
    %c0_1 = arith.constant 0 : index
    %3 = vector.load %arg1[%c40, %c0_1] : memref<128x128xf32, #tpu.memory_space<vmem>>, vector<4x128xf32>
    %4 = arith.maximumf %2, %3 : vector<4x128xf32>
    %c55 = arith.constant 55 : index
    %c0_2 = arith.constant 0 : index
    %5 = vector.load %arg1[%c55, %c0_2] : memref<128x128xf32, #tpu.memory_space<vmem>>, vector<4x128xf32>
    %6 = arith.maximumf %4, %5 : vector<4x128xf32>
    %c60 = arith.constant 60 : index
    %c0_3 = arith.constant 0 : index
    %7 = vector.load %arg1[%c60, %c0_3] : memref<128x128xf32, #tpu.memory_space<vmem>>, vector<4x128xf32>
    %8 = arith.maximumf %6, %7 : vector<4x128xf32>
    %c65 = arith.constant 65 : index
    %c0_4 = arith.constant 0 : index
    %9 = vector.load %arg1[%c65, %c0_4] : memref<128x128xf32, #tpu.memory_space<vmem>>, vector<4x128xf32>
    %10 = arith.maximumf %8, %9 : vector<4x128xf32>
    %c80 = arith.constant 80 : index
    %c0_5 = arith.constant 0 : index
    %11 = vector.load %arg1[%c80, %c0_5] : memref<128x128xf32, #tpu.memory_space<vmem>>, vector<4x128xf32>
    %12 = arith.maximumf %10, %11 : vector<4x128xf32>
    %c85 = arith.constant 85 : index
    %c0_6 = arith.constant 0 : index
    %13 = vector.load %arg1[%c85, %c0_6] : memref<128x128xf32, #tpu.memory_space<vmem>>, vector<4x128xf32>
    %14 = arith.maximumf %12, %13 : vector<4x128xf32>
    %c90 = arith.constant 90 : index
    %c0_7 = arith.constant 0 : index
    %15 = vector.load %arg1[%c90, %c0_7] : memref<128x128xf32, #tpu.memory_space<vmem>>, vector<4x128xf32>
    %16 = arith.maximumf %14, %15 : vector<4x128xf32>
    %c0_8 = arith.constant 0 : index
    %c0_9 = arith.constant 0 : index
    %17 = vector.load %arg3[%c0_8, %c0_9] : memref<20x128xf32, #tpu.memory_space<vmem>>, vector<4x128xf32>
    tpu.vector_store %arg3[%c0_8, %c0_9], %16 {strides = array<i32>} : memref<20x128xf32, #tpu.memory_space<vmem>>, vector<4x128xf32>,
    %c0_10 = arith.constant 0 : index
    %c0_11 = arith.constant 0 : index
    %18 = vector.load %arg2[%c0_10, %c0_11] : memref<16x128xf32, #tpu.memory_space<vmem>>, vector<16x128xf32>
    %c0_12 = arith.constant 0 : index
    %c0_13 = arith.constant 0 : index
    %19 = vector.load %arg1[%c0_12, %c0_13] : memref<128x128xf32, #tpu.memory_space<vmem>>, vector<128x128xf32>
    %cst = arith.constant dense<0.000000e+00> : vector<16x128xf32>
    %20 = tpu.matmul %18, %19, %cst {dimension_numbers = #tpu.dot_dimension_numbers<[1], [0], [0], [1], [0, 0, 1, 1], [], []>} : vector<16x128xf32>, vector<128x128xf32>, vector<16x128xf32> -> vector<16x128xf32>
    %c4 = arith.constant 4 : index
    %c0_14 = arith.constant 0 : index
    %21 = vector.load %arg3[%c4, %c0_14] : memref<20x128xf32, #tpu.memory_space<vmem>>, vector<16x128xf32>
    tpu.vector_store %arg3[%c4, %c0_14], %20 {strides = array<i32>} : memref<20x128xf32, #tpu.memory_space<vmem>>, vector<16x128xf32>,
    return
  }
  func.func @transform_0(%arg0: i32) -> (i32, i32) {
    %c0_i32 = arith.constant 0 : i32
    %c0_i32_0 = arith.constant 0 : i32
    return %c0_i32, %arg0 : i32, i32
  }
  func.func @transform_1(%arg0: i32) -> (i32, i32) {
    %c0_i32 = arith.constant 0 : i32
    %c0_i32_0 = arith.constant 0 : i32
    %c0_i32_1 = arith.constant 0 : i32
    return %c0_i32, %c0_i32_0 : i32, i32
  }
  func.func @transform_2(%arg0: i32) -> (i32, i32) {
    %c0_i32 = arith.constant 0 : i32
    %c0_i32_0 = arith.constant 0 : i32
    return %c0_i32, %arg0 : i32, i32
  }
}

</mosaic_0001>

<bundles_post_ra>
// kernel: forward.1
= control target key start
LH: loop header
LB: loop body
LE: loop exit
PB: predicated region body
PF: predicated region fallthrough
CT: control target
= control target key end

     0   :  { %s318_s0 = inlined_call_operand.vmem [shape: f32[128,128], index: 0, kind: input, shape index: {}]   ;;  %s319_s1 = inlined_call_operand.vmem [shape: f32[16,128], index: 1, kind: input, shape index: {}]   ;;  %s320_s2 = inlined_call_operand.vmem [shape: f32[20,128], index: 2, kind: output, shape index: {}]  }
   0x1   :  { %v31_v0 = vld [vmem:[%s318_s0] sm:$0xff]  ;;  %v32_v1 = vld [vmem:[%s318_s0 + $0x8] sm:$0xff]  ;;  %v33_v2 = vld [vmem:[%s318_s0 + $0x10] sm:$0xff] }
   0x2   :  { %v181_v3 = vpack.c.bf16 %v32_v1, %v31_v0  ;;  %v34_v4 = vld [vmem:[%s318_s0 + $0x18] sm:$0xff]  ;;  %v35_v6 = vld [vmem:[%s318_s0 + $0x20] sm:$0xff]  ;;  %v36_v7 = vld [vmem:[%s318_s0 + $0x28] sm:$0xff] }
   0x3   :  { %v185_v5 = vpack.c.bf16 %v34_v4, %v33_v2  ;;  %v189_v8 = vpack.c.bf16 %v36_v7, %v35_v6  ;;  %v37_v9 = vld [vmem:[%s318_s0 + $0x30] sm:$0xff]  ;;  %v38_v10 = vld [vmem:[%s318_s0 + $0x38] sm:$0xff]  ;;  %v29_v11 = vld [vmem:[%s319_s1] sm:$0xff] }
   0x4   :  { %182 = vmatprep.subr.bf16.mxu0 %v181_v3  ;;  %178 = vmatprep.mubr.f32.mxu0 %v29_v11  ;;  %v11_v12 = vld [vmem:[%s318_s0 + $0x1e] sm:$0xf]  ;;  %v12_v13 = vld [vmem:[%s318_s0 + $0x23] sm:$0xf]  ;;  %v14_v14 = vld [vmem:[%s318_s0 + $0x28] sm:$0xf]  ;;  %v193_v17 = vpack.c.bf16 %v38_v10, %v37_v9 }
   0x5   :  { %184 = vmatpush3.bf16.msra.mxu0 %v181_v3  ;;  %v13_v15 = vmax.f32 %v11_v12, %v12_v13  ;;  %v16_v16 = vld [vmem:[%s318_s0 + $0x37] sm:$0xf]  ;;  %v39_v19 = vld [vmem:[%s318_s0 + $0x40] sm:$0xff]  ;;  %v40_v20 = vld [vmem:[%s318_s0 + $0x48] sm:$0xff] }
   0x6   :  { %186 = vmatprep.subr.bf16.mxu0 %v185_v5  ;;  %v18_v21 = vld [vmem:[%s318_s0 + $0x3c] sm:$0xf]  ;;  %v20_v23 = vld [vmem:[%s318_s0 + $0x41] sm:$0xf]  ;;  %v197_v24 = vpack.c.bf16 %v40_v20, %v39_v19  ;;  %v41_v26 = vld [vmem:[%s318_s0 + $0x50] sm:$0xff] }
   0x7   :  { %v15_v18 = vmax.f32 %v13_v15, %v14_v14  ;;  %v42_v27 = vld [vmem:[%s318_s0 + $0x58] sm:$0xff]  ;;  %v22_v28 = vld [vmem:[%s318_s0 + $0x50] sm:$0xf]  ;;  %v43_v33 = vld [vmem:[%s318_s0 + $0x60] sm:$0xff] }
   0x8   :  { %v24_v30 = vld [vmem:[%s318_s0 + $0x55] sm:$0xf]  ;;  %v201_v31 = vpack.c.bf16 %v42_v27, %v41_v26  ;;  %v44_v34 = vld [vmem:[%s318_s0 + $0x68] sm:$0xff]  ;;  %v26_v35 = vld [vmem:[%s318_s0 + $0x5a] sm:$0xf] }
   0x9   :  { %188 = vmatpush3.bf16.msra.mxu0 %v185_v5  ;;  %v17_v22 = vmax.f32 %v15_v18, %v16_v16  ;;  %v205_v37 = vpack.c.bf16 %v44_v34, %v43_v33  ;;  %v45_v39 = vld [vmem:[%s318_s0 + $0x70] sm:$0xff]  ;;  %v46_v40 = vld [vmem:[%s318_s0 + $0x78] sm:$0xff]  ;;  %v30_v42 = vld [vmem:[%s319_s1 + $0x8] sm:$0xff] }
   0xa   :  { %190 = vmatprep.subr.bf16.mxu0 %v189_v8  ;;  %v209_v41 = vpack.c.bf16 %v46_v40, %v45_v39 }
   0xb   :  { %v19_v25 = vmax.f32 %v17_v22, %v18_v21 }
   0xd   :  { %192 = vmatpush3.bf16.msra.mxu0 %v189_v8  ;;  %v21_v29 = vmax.f32 %v19_v25, %v20_v23 }
   0xe   :  { %194 = vmatprep.subr.bf16.mxu0 %v193_v17 }
   0xf   :  { %v23_v32 = vmax.f32 %v21_v29, %v22_v28 }
  0x11   :  { %196 = vmatpush3.bf16.msra.mxu0 %v193_v17  ;;  %v25_v36 = vmax.f32 %v23_v32, %v24_v30 }
  0x12   :  { %198 = vmatprep.subr.bf16.mxu0 %v197_v24 }
  0x13   :  { %v27_v38 = vmax.f32 %v25_v36, %v26_v35 }
  0x15   :  { %200 = vmatpush3.bf16.msra.mxu0 %v197_v24  ;;  %28 = vst [vmem:[%s320_s2] sm:$0xf] %v27_v38 }
  0x16   :  { %202 = vmatprep.subr.bf16.mxu0 %v201_v31 }
  0x19   :  { %204 = vmatpush3.bf16.msra.mxu0 %v201_v31 }
  0x1a   :  { %206 = vmatprep.subr.bf16.mxu0 %v205_v37 }
  0x1d   :  { %208 = vmatpush3.bf16.msra.mxu0 %v205_v37 }
  0x1e   :  { %210 = vmatprep.subr.bf16.mxu0 %v209_v41 }
  0x21   :  { %212 = vmatpush3.bf16.msra.mxu0 %v209_v41 }
  0x24   :  { %179 = vmatmul.mubr.f32.vlgmr.msra.gmra.mrb[0].mxu0 %v30_v42 }
  0xf7   :  { %v180_v43 = vpop.f32.mrb[0].mxu0 }
  0xf8   :  { %123 = vst [vmem:[%s320_s2 + $0xc] sm:$0xff] %v180_v43  ;;  %v113_v44 = vpop.f32.mrb[1].mxu0 }
  0xf9   :  { %122 = vst [vmem:[%s320_s2 + $0x4] sm:$0xff] %v113_v44 }

</bundles_post_ra>
